<compile_context>
chip_gen: v5e
topology: v5e:2x2
jax: 0.10.0
libtpu: 0.0.40
codegen_flags: <defaults>
</compile_context>

<pallas_src>
import functools

import jax
import jax.numpy as jnp
from jax.experimental import pallas as pl
from jax.experimental.pallas import tpu as pltpu


def _gate_kernel(x_ref, h_ref, wx_ref, wh_ref, b_ref, o_ref, *, act):
    # x_ref: (bb, D)  h_ref: (bb, H)  wx_ref: (D, H)  wh_ref: (H, H)
    # b_ref: (1, H)   o_ref: (bb, H)
    x = x_ref[...].astype(wx_ref.dtype)          # cast to bf16 on the VPU
    h = h_ref[...].astype(wh_ref.dtype)
    acc = jnp.dot(x, wx_ref[...], preferred_element_type=jnp.float32)
    acc = acc + jnp.dot(h, wh_ref[...], preferred_element_type=jnp.float32)
    acc = acc + b_ref[...]                       # bias broadcast over batch
    o_ref[...] = act(acc).astype(o_ref.dtype)


def prepare_gate_params(W, b, input_size, *, compute_dtype=jnp.bfloat16):
    """One-time conversion of PyTorch nn.Linear params (W:(H, D+H), b:(H,))
    into the kernel layout: Wx (D,H), Wh (H,H) in compute_dtype, b2 (1,H) f32.
    Call once at init, NOT per forward step."""
    D = input_size
    Wx = jnp.transpose(W[:, :D]).astype(compute_dtype)    # (D, H)
    Wh = jnp.transpose(W[:, D:]).astype(compute_dtype)    # (H, H)
    b2 = b.reshape(1, -1).astype(jnp.float32)              # (1, H)
    return Wx, Wh, b2


def gate_forward(x, h_pre, Wx, Wh, b2, *, active_func=jax.nn.sigmoid,
                 block_b=512):
    """Gate.forward: active_func(cat([x, h_pre], 1) @ W.T + b).

    x: (B, D), h_pre: (B, H), Wx: (D, H), Wh: (H, H), b2: (1, H).
    Returns (B, H) float32.
    """
    B, D = x.shape
    H = Wh.shape[0]

    # Single tile at small B; 512-row tiles (sublane-aligned) at large B.
    bb = B if B <= block_b else block_b
    grid = (pl.cdiv(B, bb),)

    kernel = functools.partial(_gate_kernel, act=active_func)

    return pl.pallas_call(
        kernel,
        out_shape=jax.ShapeDtypeStruct((B, H), jnp.float32),
        grid=grid,
        in_specs=[
            pl.BlockSpec((bb, D), lambda i: (i, 0)),     # x tile
            pl.BlockSpec((bb, H), lambda i: (i, 0)),     # h_pre tile
            pl.BlockSpec((D, H), lambda i: (0, 0)),      # Wx (resident)
            pl.BlockSpec((H, H), lambda i: (0, 0)),      # Wh (resident)
            pl.BlockSpec((1, H), lambda i: (0, 0)),      # bias (resident)
        ],
        out_specs=pl.BlockSpec((bb, H), lambda i: (i, 0)),
        compiler_params=pltpu.CompilerParams(
            dimension_semantics=("parallel",)),
    )(x, h_pre, Wx, Wh, b2)


# Pure-JAX f32 reference of the PyTorch forward (for the correctness check).
def _gate_ref(x, h_pre, W, b, active_func):
    xh = jnp.concatenate([x, h_pre], axis=1)
    return active_func(xh @ W.T + b)


def init_params(key, input_size, hidden_dim):
    # Match nn.Linear's default init: U(-k, k), k = 1/sqrt(fan_in).
    kw, kb = jax.random.split(key)
    fan_in = input_size + hidden_dim
    bound = 1.0 / jnp.sqrt(jnp.asarray(fan_in, jnp.float32))
    W = jax.random.uniform(kw, (hidden_dim, fan_in), jnp.float32,
                           minval=-bound, maxval=bound)
    b = jax.random.uniform(kb, (hidden_dim,), jnp.float32,
                           minval=-bound, maxval=bound)
    return W, b


if __name__ == "__main__":
    INPUT_SIZE = 16
    HIDDEN = 128   # lane-dense output (last dim >= 128 -> unmasked stores)
    M = 5          # Gate.__init__ takes M but never uses it in forward.
    BATCH = 8

    key = jax.random.PRNGKey(0)
    kp, kx, kh = jax.random.split(key, 3)
    W, b = init_params(kp, INPUT_SIZE, HIDDEN)

    # One-time param prep (split / transpose / bf16 cast) -- outside forward.
    Wx, Wh, b2 = prepare_gate_params(W, b, INPUT_SIZE)

    x = jax.random.normal(kx, (BATCH, INPUT_SIZE), jnp.float32)
    h_pre = jax.random.normal(kh, (BATCH, HIDDEN), jnp.float32)

    # active_func is a runtime callable in PyTorch; here it is closed over at
    # trace time (sigmoid, as typical for a gate).
    fwd = jax.jit(functools.partial(gate_forward, active_func=jax.nn.sigmoid))
    out = fwd(x, h_pre, Wx, Wh, b2)
    jax.block_until_ready(out)

    ref = _gate_ref(x, h_pre, W, b, jax.nn.sigmoid)
    assert out.shape == (BATCH, HIDDEN)
    # bf16 matmul operands (f32 accumulation) -> loosen tolerance vs f32 ref.
    assert jnp.allclose(out, ref, atol=1e-2, rtol=1e-2), "mismatch vs reference"

    print("KERNEL_OK")
</pallas_src>

<mosaic_0001>
module attributes {stable_mosaic.version = 11 : i64} {
  func.func @_gate_kernel(%arg0: i32, %arg1: memref<8x16xf32, #tpu.memory_space<vmem>>, %arg2: memref<8x128xf32, #tpu.memory_space<vmem>>, %arg3: memref<16x128xbf16, #tpu.memory_space<vmem>>, %arg4: memref<128x128xbf16, #tpu.memory_space<vmem>>, %arg5: memref<1x128xf32, #tpu.memory_space<vmem>>, %arg6: memref<8x128xf32, #tpu.memory_space<vmem>>) attributes {dimension_semantics = [#tpu.dimension_semantics<parallel>], iteration_bounds = array<i64: 1>, scalar_prefetch = 0 : i64, scratch_operands = 0 : i64, tpu.core_type = #tpu.core_type<tc>, window_params = [{transform_indices = @transform_0, window_bounds = array<i64: 8, 16>}, {transform_indices = @transform_1, window_bounds = array<i64: 8, 128>}, {pipeline_mode = #tpu.pipeline_mode<synchronous>, transform_indices = @transform_2, window_bounds = array<i64: 16, 128>}, {pipeline_mode = #tpu.pipeline_mode<synchronous>, transform_indices = @transform_3, window_bounds = array<i64: 128, 128>}, {pipeline_mode = #tpu.pipeline_mode<synchronous>, transform_indices = @transform_4, window_bounds = array<i64: 1, 128>}, {transform_indices = @transform_5, window_bounds = array<i64: 8, 128>}]} {
    %c0 = arith.constant 0 : index
    %c0_0 = arith.constant 0 : index
    %0 = vector.load %arg1[%c0, %c0_0] : memref<8x16xf32, #tpu.memory_space<vmem>>, vector<8x16xf32>
    %1 = arith.truncf %0 : vector<8x16xf32> to vector<8x16xbf16>
    %c0_1 = arith.constant 0 : index
    %c0_2 = arith.constant 0 : index
    %2 = vector.load %arg2[%c0_1, %c0_2] : memref<8x128xf32, #tpu.memory_space<vmem>>, vector<8x128xf32>
    %3 = arith.truncf %2 : vector<8x128xf32> to vector<8x128xbf16>
    %c0_3 = arith.constant 0 : index
    %c0_4 = arith.constant 0 : index
    %4 = vector.load %arg3[%c0_3, %c0_4] : memref<16x128xbf16, #tpu.memory_space<vmem>>, vector<16x128xbf16>
    %cst = arith.constant dense<0.000000e+00> : vector<8x128xf32>
    %5 = tpu.matmul %1, %4, %cst {dimension_numbers = #tpu.dot_dimension_numbers<[1], [0], [0], [1], [0, 0, 1, 1], [], []>} : vector<8x16xbf16>, vector<16x128xbf16>, vector<8x128xf32> -> vector<8x128xf32>
    %c0_5 = arith.constant 0 : index
    %c0_6 = arith.constant 0 : index
    %6 = vector.load %arg4[%c0_5, %c0_6] : memref<128x128xbf16, #tpu.memory_space<vmem>>, vector<128x128xbf16>
    %cst_7 = arith.constant dense<0.000000e+00> : vector<8x128xf32>
    %7 = tpu.matmul %3, %6, %cst_7 {dimension_numbers = #tpu.dot_dimension_numbers<[1], [0], [0], [1], [0, 0, 1, 1], [], []>} : vector<8x128xbf16>, vector<128x128xbf16>, vector<8x128xf32> -> vector<8x128xf32>
    %8 = arith.addf %5, %7 : vector<8x128xf32>
    %c0_8 = arith.constant 0 : index
    %c0_9 = arith.constant 0 : index
    %9 = vector.load %arg5[%c0_8, %c0_9] : memref<1x128xf32, #tpu.memory_space<vmem>>, vector<1x128xf32>
    %10 = vector.broadcast %9 : vector<1x128xf32> to vector<8x128xf32>
    %11 = arith.addf %8, %10 : vector<8x128xf32>
    %12 = arith.negf %11 : vector<8x128xf32>
    %13 = math.exp %12 : vector<8x128xf32>
    %cst_10 = arith.constant 1.000000e+00 : f32
    %14 = vector.broadcast %cst_10 : f32 to vector<8x128xf32>
    %15 = arith.addf %14, %13 : vector<8x128xf32>
    %16 = arith.divf %14, %15 : vector<8x128xf32>
    %c0_11 = arith.constant 0 : index
    %c0_12 = arith.constant 0 : index
    %17 = vector.load %arg6[%c0_11, %c0_12] : memref<8x128xf32, #tpu.memory_space<vmem>>, vector<8x128xf32>
    tpu.vector_store %arg6[%c0_11, %c0_12], %16 {strides = array<i32>} : memref<8x128xf32, #tpu.memory_space<vmem>>, vector<8x128xf32>,
    return
  }
  func.func @transform_0(%arg0: i32) -> (i32, i32) {
    %c0_i32 = arith.constant 0 : i32
    %c0_i32_0 = arith.constant 0 : i32
    return %arg0, %c0_i32 : i32, i32
  }
  func.func @transform_1(%arg0: i32) -> (i32, i32) {
    %c0_i32 = arith.constant 0 : i32
    %c0_i32_0 = arith.constant 0 : i32
    return %arg0, %c0_i32 : i32, i32
  }
  func.func @transform_2(%arg0: i32) -> (i32, i32) {
    %c0_i32 = arith.constant 0 : i32
    %c0_i32_0 = arith.constant 0 : i32
    %c0_i32_1 = arith.constant 0 : i32
    return %c0_i32, %c0_i32_0 : i32, i32
  }
  func.func @transform_3(%arg0: i32) -> (i32, i32) {
    %c0_i32 = arith.constant 0 : i32
    %c0_i32_0 = arith.constant 0 : i32
    %c0_i32_1 = arith.constant 0 : i32
    return %c0_i32, %c0_i32_0 : i32, i32
  }
  func.func @transform_4(%arg0: i32) -> (i32, i32) {
    %c0_i32 = arith.constant 0 : i32
    %c0_i32_0 = arith.constant 0 : i32
    %c0_i32_1 = arith.constant 0 : i32
    return %c0_i32, %c0_i32_0 : i32, i32
  }
  func.func @transform_5(%arg0: i32) -> (i32, i32) {
    %c0_i32 = arith.constant 0 : i32
    %c0_i32_0 = arith.constant 0 : i32
    return %arg0, %c0_i32 : i32, i32
  }
}

</mosaic_0001>

<bundles_post_ra>
// kernel: gate_forward.1
= control target key start
LH: loop header
LB: loop body
LE: loop exit
PB: predicated region body
PF: predicated region fallthrough
CT: control target
= control target key end

     0   :  { %10 = vsyncpa [#allocation3], 0  ;;  %s473_s0 = inlined_call_operand.hbm [shape: f32[8,16], index: 0, kind: input, shape index: {}]   ;;  %s474_s1 = inlined_call_operand.hbm [shape: f32[8,128], index: 1, kind: input, shape index: {}]   ;;  %s475_s2 = inlined_call_operand.hbm [shape: bf16[16,128], index: 2, kind: input, shape index: {}]   ;;  %s476_s3 = inlined_call_operand.hbm [shape: bf16[128,128], index: 3, kind: input, shape index: {}]   ;;  %s477_s4 = inlined_call_operand.vmem [shape: f32[1,128], index: 4, kind: input, shape index: {}]   ;;  %s478_s5 = inlined_call_operand.hbm [shape: f32[8,128], index: 5, kind: output, shape index: {}]  }
   0x1   :  { %11 = vsyncpa [#allocation6], 0 }
   0x2   :  { %12 = vsyncpa [#allocation9], 0  ;;  %s30_s20 = sshll.u32 %s474_s1, 4  ;;  %s31_s20 = int_to_ptr.hbm [resolvable:$true] %s30_s20 }
   0x3   :  { %13 = vsyncpa [#allocation4], 0  ;;  %s418_s21 = smov [#allocation5]   ;;  %s19_s25 = sshll.u32 %s473_s0, 4  ;;  %s20_s25 = int_to_ptr.hbm [resolvable:$true] %s19_s25 }
   0x4   :  { %s32_s22 = sshll.u32 %s418_s21, 4  ;;  %s419_s26 = smov [#allocation2]   ;;  %s33_s22 = int_to_ptr.vmem [resolvable:$true] %s32_s22 }
   0x5   :  { %35 = dma.hbm_to_vmem [thread:$0]  %s31_s20, 128, %s33_s22, [#allocation6]  }
   0x6   :  { %s21_s27 = sshll.u32 %s419_s26, 4  ;;  %s40_s30 = sshll.u32 %s475_s2, 4  ;;  %s22_s27 = int_to_ptr.vmem [resolvable:$true] %s21_s27  ;;  %s41_s30 = int_to_ptr.hbm [resolvable:$true] %s40_s30 }
   0x7   :  { %24 = dma.hbm_to_vmem [thread:$0]  %s20_s25, 128, %s22_s27, [#allocation3]  }
   0x8   :  { %s420_s1 = smov [#allocation7]   ;;  %s53_s9 = sshll.u32 %s476_s3, 4  ;;  %s54_s9 = int_to_ptr.hbm [resolvable:$true] %s53_s9 }
   0x9   :  { %s42_s6 = sshll.u32 %s420_s1, 4  ;;  %s421_s10 = smov 64   ;;  %s43_s6 = int_to_ptr.vmem [resolvable:$true] %s42_s6 }
   0xa   :  { %s422_s0 = smov 4   ;;  %s423_s11 = smov [#allocation8]  }
   0xb   :  { %48 = dma.hbm_to_vmem [thread:$0]  %s41_s30, 128, %s43_s6, [#allocation6], %s421_s10, %s421_s10, %s422_s0  }
   0xc   :  { %s55_s12 = sshll.u32 %s423_s11, 4  ;;  %s56_s12 = int_to_ptr.vmem [resolvable:$true] %s55_s12 }
   0xd   :  { %61 = dma.hbm_to_vmem [thread:$0]  %s54_s9, 1024, %s56_s12, [#allocation9], %s421_s10, %s421_s10, %s422_s0  }
   0xe   :  { %410 = dma.done.wait [#allocation3], 128  }
   0xf   :  { %411 = vsyncadd [#allocation3], 4294967168 }
  0x10   :  { %412 = dma.done.wait [#allocation6], 256  }
  0x11   :  { %413 = vsyncadd [#allocation6], 4294967040 }
  0x12   :  { %414 = dma.done.wait [#allocation9], 1024  }
  0x13   :  { %415 = vsyncadd [#allocation9], 4294966272  ;;  %v277_v0 = vld [vmem:[#allocation8 + $0x38] sm:$0xff]  ;;  %v276_v1 = vld [vmem:[#allocation8 + $0x30] sm:$0xff]  ;;  %vm170_vm0 = vcmask 130048   ;;  %s424_s13 = smov [#allocation10]  }
  0x14   :  { %151 = vmatpush.bf16.msra.mxu0 %v277_v0  ;;  %v269_v2 = vld [vmem:[#allocation7] sm:$0xff]  ;;  %v81_v3 = vld [vmem:[#allocation2] sm:$0xff]  ;;  %v274_v6 = vld [vmem:[#allocation8 + $0x20] sm:$0xff]  ;;  %s217_s14 = sshll.u32 %s424_s13, 4  ;;  %s219_s16 = sshll.u32 %s478_s5, 4  ;;  %s218_s14 = int_to_ptr.vmem [resolvable:$true] %s217_s14  ;;  %s220_s16 = int_to_ptr.hbm [resolvable:$true] %s219_s16 }
  0x15   :  { %v82_v4 = vpack.c.bf16 %v81_v3, %v81_v3  ;;  %181 = vmatpush.bf16.msra.mxu1 %v269_v2  ;;  %v275_v5 = vld [vmem:[#allocation8 + $0x28] sm:$0xff]  ;;  %v273_v7 = vld [vmem:[#allocation8 + $0x18] sm:$0xff]  ;;  %v272_v8 = vld [vmem:[#allocation8 + $0x10] sm:$0xff] }
  0x16   :  { %v271_v9 = vld [vmem:[#allocation8 + $0x8] sm:$0xff]  ;;  %v270_v10 = vld [vmem:[#allocation8] sm:$0xff]  ;;  %v83_v11 = vld [vmem:[#allocation5] sm:$0xff] }
  0x17   :  { %v84_v12 = vpack.c.bf16 %v83_v11, %v83_v11  ;;  %v285_v15 = vld [vmem:[%s477_s4] ss:$0 sm:$0xff] }
  0x18   :  { %152 = vmatpush.bf16.msra.mxu0 %v276_v1  ;;  %267 = vmatmul.msk.bf16.vlgmr.msra.gmra.mxu1 %vm170_vm0, %v82_v4 }
  0x1c   :  { %153 = vmatpush.bf16.msra.mxu0 %v275_v5 }
  0x20   :  { %154 = vmatpush.bf16.msra.mxu0 %v274_v6 }
  0x24   :  { %155 = vmatpush.bf16.msra.mxu0 %v273_v7 }
  0x28   :  { %156 = vmatpush.bf16.msra.mxu0 %v272_v8 }
  0x2c   :  { %157 = vmatpush.bf16.msra.mxu0 %v271_v9 }
  0x30   :  { %158 = vmatpush.bf16.msra.mxu0 %v270_v10 }
  0x33   :  { %159 = vmatmul.bf16.vlgmr.msra.gmra.mxu0 %v84_v12 }
  0x95   :  { %v183_v13 = vpop.f32.mrf.mxu1 }
  0x9d   :  { %v185_v14 = vpop.f32.mrf.mxu1 }
  0xb0   :  { %v160_v16 = vpop.f32.mrf.mxu0 }
  0xb1   :  { %v184_v17 = vadd.f32 %v183_v13, %v160_v16 }
  0xb3   :  { %v191_v18 = vadd.f32 %v285_v15, %v184_v17 }
  0xb5   :  { %v268_v19 = vmul.f32 -1.442695, %v191_v18 }
  0xb7   :  { %286 = vpow2.f32 %v268_v19 }
  0xb8   :  { %v162_v20 = vpop.f32.mrf.mxu0 }
  0xbd   :  { %v287_v21 = vpop.eup %286 }
  0xbe   :  { %v195_v22 = vadd.f32 1.0, %v287_v21 }
  0xc0   :  { %288 = vrcp.f32 %v195_v22  ;;  %v207_v26 = vand.u32 2147483648, %v195_v22  ;;  %v205_v28 = vand.u32 2147483647, %v195_v22  ;;  %vm201_vm2 = vweird.f32 %v195_v22 }
  0xc2   :  { %v208_v30 = vor.u32 1.1754944e-38, %v207_v26  ;;  %vm206_vm4 = vcmp.eq.f32.partialorder %v205_v28, 8.507059e+37 }
  0xc6   :  { %v289_v23 = vpop.eup %288 }
  0xc7   :  { %v197_v24 = vmul.f32 %v289_v23, %v195_v22  ;;  %vm202_vm1 = vweird.f32 %v289_v23 }
  0xc8   :  { %vm203_vm3 = vmor %vm201_vm2, %vm202_vm1 }
  0xc9   :  { %v198_v25 = vsub.f32 1.0, %v197_v24 }
  0xcb   :  { %v199_v27 = vmul.f32 %v289_v23, %v198_v25 }
  0xcd   :  { %v200_v29 = vadd.f32 %v289_v23, %v199_v27 }
  0xcf   :  { %v204_v31 = vsel %vm203_vm3, %v289_v23, %v200_v29 }
  0xd0   :  { %v209_v32 = vsel %vm206_vm4, %v208_v30, %v204_v31 }
  0xd1   :  { %211 = vst [vmem:[#allocation10] sm:$0xff] %v209_v32 }
  0xd2   :  { %222 = dma.vmem_to_hbm [thread:$0]  %s218_s14, 128, %s220_s16, [#allocation4]  }
  0xd3   :  { %416 = dma.done.wait [#allocation4], 128  }
  0xd4   :  { %417 = vsyncadd [#allocation4], 4294967168 }
  0xd5   :  { %227 = vsyncpa [#allocation3], 1 }
  0xd6   :  { %228 = vsyncpa [#allocation6], 1 }
  0xd7   :  { %229 = vsyncpa [#allocation9], 1 }
  0xd8   :  { %230 = vsyncpa [#allocation4], 1 }

</bundles_post_ra>
